<compile_context>
chip_gen: v6e
topology: v6e:2x2x1
jax: 0.10.0
libtpu: 0.0.40
codegen_flags: <defaults>
</compile_context>

<pallas_src>
import inspect

import jax
import jax.numpy as jnp
from jax.experimental import pallas as pl
from jax.experimental.pallas import tpu as pltpu


def residual_block_kernel(x_ref, w1_ref, b1_ref, w2_ref, b2_ref, o_ref):
    # x_ref: (TB, D); w1/w2: (D, D) bf16 or f32; b1/b2: (1, D) f32; o_ref: (TB, D)
    xm = x_ref[...].astype(w1_ref.dtype)              # only the matmul operand is live

    # first linear + ReLU (f32 accumulate on the MXU, f32 elementwise on the VPU)
    h = jnp.dot(xm, w1_ref[...], preferred_element_type=jnp.float32) + b1_ref[...]
    h = jnp.maximum(h, 0.0)

    # TODO(synk): training-mode dropout (p=0.1) via pltpu.prng_seed/prng_random_bits
    # (seeded per grid step); nn.Dropout is identity in eval mode, so omitted here.

    # second linear + residual.  Re-read x from VMEM in the epilogue so the f32
    # residual is not live across both matmuls (no vreg spills at tb=256).
    y = jnp.dot(h.astype(w2_ref.dtype), w2_ref[...],
                preferred_element_type=jnp.float32) + b2_ref[...]
    o_ref[...] = (x_ref[...].astype(jnp.float32) + y).astype(o_ref.dtype)


_HAS_BUFFERED = (
    hasattr(pl, "Buffered")
    and "pipeline_mode" in inspect.signature(pl.BlockSpec).parameters
)


def _const_spec(shape):
    """BlockSpec for a grid-constant operand; single-buffered when supported."""
    index_map = lambda i: (0,) * len(shape)
    if _HAS_BUFFERED:
        return pl.BlockSpec(shape, index_map, pipeline_mode=pl.Buffered(1))
    return pl.BlockSpec(shape, index_map)


def _vmem_cap_bytes():
    """Per-TensorCore VMEM capacity minus ~15% headroom for compiler scratch."""
    try:
        cap = int(pltpu.get_tpu_info().vmem_capacity_bytes)
    except Exception:
        cap = 64 << 20  # conservative: v7x has 64 MiB/TC (v5e/v6e have 128 MiB)
    return int(cap * 0.85)


def _pick_batch_tile(batch, tb_max=256, target_steps=8):
    """Choose the batch tile.

    Small batch (<= tb_max): one full-batch tile (block == full dim, always legal;
    1-2 grid steps is correct at demo sizes where step overhead dominates anyway).
    Large batch: sublane-aligned tile <= tb_max, shrunk if needed so the grid has
    >= target_steps steps (>= 3-4 per v7x TensorCore) so BlockSpec double-buffering
    actually overlaps the x/out DMA with compute on this bandwidth-bound kernel.
    """
    if batch <= tb_max:
        return batch
    tb = max(8, tb_max - tb_max % 8)
    if batch >= 2048:
        while batch // tb < target_steps and tb > 64:
            tb //= 2
        tb = max(8, tb - tb % 8)
    return tb


def residual_block(x, w1, b1, w2, b2, *, tb=256, use_bf16=True, out_dtype=None):
    """y = x + (ReLU(x @ w1 + b1) @ w2 + b2).

    w1/w2 are (in_dim, out_dim), i.e. the transpose of the PyTorch nn.Linear weight.
    For repeated calls pre-cast w1/w2 to bf16 once outside; the cast below is
    skipped when the dtype already matches.  out_dtype=jnp.bfloat16 halves the
    output HBM stream if the surrounding model tolerates a bf16 residual.
    """
    B, D = x.shape
    out_dtype = x.dtype if out_dtype is None else out_dtype

    mm_dtype = jnp.bfloat16 if use_bf16 else jnp.float32
    w1m = w1 if w1.dtype == mm_dtype else w1.astype(mm_dtype)
    w2m = w2 if w2.dtype == mm_dtype else w2.astype(mm_dtype)
    b1f = jnp.asarray(b1, jnp.float32).reshape(1, D)
    b2f = jnp.asarray(b2, jnp.float32).reshape(1, D)

    # Batch tiling; zero-pad rows so an awkward B never degrades the tile to 8 rows.
    tb = _pick_batch_tile(B, tb)
    n_steps = pl.cdiv(B, tb)
    Bp = n_steps * tb
    xp = x if Bp == B else jnp.pad(x, ((0, Bp - B), (0, 0)))

    # ---- VMEM budget (per TensorCore): resident weights/biases (+double-buffered on
    #      the fallback path) + double-buffered x/out tiles, 25%+4MiB headroom,
    #      capped at 85% of this generation's physical VMEM.
    w_mult = 1 if _HAS_BUFFERED else 2
    w_bytes = (w1m.size + w2m.size) * jnp.dtype(mm_dtype).itemsize
    b_bytes = (b1f.size + b2f.size) * 4
    x_tile = tb * D * x.dtype.itemsize
    o_tile = tb * D * jnp.dtype(out_dtype).itemsize
    vmem_needed = w_mult * (w_bytes + b_bytes) + 2 * (x_tile + o_tile)
    vmem_cap = _vmem_cap_bytes()
    # TODO(synk): K/N-tiled weight path once resident weights no longer fit VMEM
    # (D >~ 3000 on v7x, ~4500+ on v5e/v6e); below that fully-resident is fastest.
    assert vmem_needed <= vmem_cap, (
        f"resident footprint {vmem_needed >> 20} MiB exceeds VMEM cap "
        f"{vmem_cap >> 20} MiB; needs the K/N-tiled weight fallback")
    vmem_limit = max(16 << 20, min(int(vmem_needed * 1.25) + (4 << 20), vmem_cap))

    flops = 4 * Bp * D * D  # two (Bp,D) x (D,D) matmuls
    bytes_accessed = (Bp * D * x.dtype.itemsize
                      + Bp * D * jnp.dtype(out_dtype).itemsize
                      + w_bytes + b_bytes)

    out = pl.pallas_call(
        residual_block_kernel,
        out_shape=jax.ShapeDtypeStruct((Bp, D), out_dtype),
        grid_spec=pltpu.PrefetchScalarGridSpec(
            num_scalar_prefetch=0,
            grid=(n_steps,),
            in_specs=[
                pl.BlockSpec((tb, D), lambda i: (i, 0)),   # x tile
                _const_spec((D, D)),                       # W1 (grid-constant, resident)
                _const_spec((1, D)),                       # b1
                _const_spec((D, D)),                       # W2
                _const_spec((1, D)),                       # b2
            ],
            out_specs=pl.BlockSpec((tb, D), lambda i: (i, 0)),
        ),
        compiler_params=pltpu.CompilerParams(
            dimension_semantics=("parallel",),             # batch axis shards across TCs
            vmem_limit_bytes=vmem_limit,
        ),
        cost_estimate=pl.CostEstimate(
            flops=flops, transcendentals=0, bytes_accessed=bytes_accessed),
    )(xp, w1m, b1f, w2m, b2f)

    return out if Bp == B else out[:B]


def reference(x, w1, b1, w2, b2):
    h = jnp.maximum(x @ w1 + b1, 0.0)
    return x + (h @ w2 + b2)


if __name__ == "__main__":
    # D=128 keeps the lane axis full; B=512 gives 2 grid steps (one per v7x TC).
    B, D = 512, 128

    key = jax.random.PRNGKey(0)
    kx, k1, k2, k3, k4 = jax.random.split(key, 5)

    x = jax.random.normal(kx, (B, D), dtype=jnp.float32)

    # Deterministic init mimicking nn.Linear's uniform(-1/sqrt(D), 1/sqrt(D)).
    bound = 1.0 / jnp.sqrt(jnp.float32(D))
    w1 = jax.random.uniform(k1, (D, D), jnp.float32, -bound, bound)
    b1 = jax.random.uniform(k2, (D,), jnp.float32, -bound, bound)
    w2 = jax.random.uniform(k3, (D, D), jnp.float32, -bound, bound)
    b2 = jax.random.uniform(k4, (D,), jnp.float32, -bound, bound)

    out = residual_block(x, w1, b1, w2, b2)
    out = jax.block_until_ready(out)

    ref = reference(x, w1, b1, w2, b2)
    # bf16 matmul operands with f32 accumulate: loose-ish tolerance vs pure-f32 ref.
    assert out.shape == ref.shape
    assert jnp.allclose(out, ref, atol=2e-2, rtol=2e-2), (
        f"mismatch vs reference, max abs err={jnp.max(jnp.abs(out - ref))}"
    )

    print("KERNEL_OK")
</pallas_src>

<mosaic_0001>
module attributes {stable_mosaic.version = 11 : i64} {
  func.func @residual_block_kernel(%arg0: i32, %arg1: memref<256x128xf32, #tpu.memory_space<vmem>>, %arg2: memref<128x128xbf16, #tpu.memory_space<vmem>>, %arg3: memref<1x128xf32, #tpu.memory_space<vmem>>, %arg4: memref<128x128xbf16, #tpu.memory_space<vmem>>, %arg5: memref<1x128xf32, #tpu.memory_space<vmem>>, %arg6: memref<256x128xf32, #tpu.memory_space<vmem>>) attributes {dimension_semantics = [#tpu.dimension_semantics<parallel>], iteration_bounds = array<i64: 2>, scalar_prefetch = 0 : i64, scratch_operands = 0 : i64, tpu.core_type = #tpu.core_type<tc>, window_params = [{transform_indices = @transform_0, window_bounds = array<i64: 256, 128>}, {pipeline_mode = #tpu.pipeline_mode<synchronous>, transform_indices = @transform_1, window_bounds = array<i64: 128, 128>}, {pipeline_mode = #tpu.pipeline_mode<synchronous>, transform_indices = @transform_2, window_bounds = array<i64: 1, 128>}, {pipeline_mode = #tpu.pipeline_mode<synchronous>, transform_indices = @transform_3, window_bounds = array<i64: 128, 128>}, {pipeline_mode = #tpu.pipeline_mode<synchronous>, transform_indices = @transform_4, window_bounds = array<i64: 1, 128>}, {transform_indices = @transform_5, window_bounds = array<i64: 256, 128>}]} {
    %c0 = arith.constant 0 : index
    %c0_0 = arith.constant 0 : index
    %0 = vector.load %arg1[%c0, %c0_0] : memref<256x128xf32, #tpu.memory_space<vmem>>, vector<256x128xf32>
    %1 = arith.truncf %0 : vector<256x128xf32> to vector<256x128xbf16>
    %c0_1 = arith.constant 0 : index
    %c0_2 = arith.constant 0 : index
    %2 = vector.load %arg2[%c0_1, %c0_2] : memref<128x128xbf16, #tpu.memory_space<vmem>>, vector<128x128xbf16>
    %cst = arith.constant dense<0.000000e+00> : vector<256x128xf32>
    %3 = tpu.matmul %1, %2, %cst {dimension_numbers = #tpu.dot_dimension_numbers<[1], [0], [0], [1], [0, 0, 1, 1], [], []>} : vector<256x128xbf16>, vector<128x128xbf16>, vector<256x128xf32> -> vector<256x128xf32>
    %c0_3 = arith.constant 0 : index
    %c0_4 = arith.constant 0 : index
    %4 = vector.load %arg3[%c0_3, %c0_4] : memref<1x128xf32, #tpu.memory_space<vmem>>, vector<1x128xf32>
    %5 = vector.broadcast %4 : vector<1x128xf32> to vector<256x128xf32>
    %6 = arith.addf %3, %5 : vector<256x128xf32>
    %cst_5 = arith.constant 0.000000e+00 : f32
    %7 = vector.broadcast %cst_5 : f32 to vector<256x128xf32>
    %8 = arith.maximumf %6, %7 : vector<256x128xf32>
    %9 = arith.truncf %8 : vector<256x128xf32> to vector<256x128xbf16>
    %c0_6 = arith.constant 0 : index
    %c0_7 = arith.constant 0 : index
    %10 = vector.load %arg4[%c0_6, %c0_7] : memref<128x128xbf16, #tpu.memory_space<vmem>>, vector<128x128xbf16>
    %cst_8 = arith.constant dense<0.000000e+00> : vector<256x128xf32>
    %11 = tpu.matmul %9, %10, %cst_8 {dimension_numbers = #tpu.dot_dimension_numbers<[1], [0], [0], [1], [0, 0, 1, 1], [], []>} : vector<256x128xbf16>, vector<128x128xbf16>, vector<256x128xf32> -> vector<256x128xf32>
    %c0_9 = arith.constant 0 : index
    %c0_10 = arith.constant 0 : index
    %12 = vector.load %arg5[%c0_9, %c0_10] : memref<1x128xf32, #tpu.memory_space<vmem>>, vector<1x128xf32>
    %13 = vector.broadcast %12 : vector<1x128xf32> to vector<256x128xf32>
    %14 = arith.addf %11, %13 : vector<256x128xf32>
    %c0_11 = arith.constant 0 : index
    %c0_12 = arith.constant 0 : index
    %15 = vector.load %arg1[%c0_11, %c0_12] : memref<256x128xf32, #tpu.memory_space<vmem>>, vector<256x128xf32>
    %16 = arith.addf %15, %14 : vector<256x128xf32>
    %c0_13 = arith.constant 0 : index
    %c0_14 = arith.constant 0 : index
    %17 = vector.load %arg6[%c0_13, %c0_14] : memref<256x128xf32, #tpu.memory_space<vmem>>, vector<256x128xf32>
    tpu.vector_store %arg6[%c0_13, %c0_14], %16 {strides = array<i32>} : memref<256x128xf32, #tpu.memory_space<vmem>>, vector<256x128xf32>,
    return
  }
  func.func @transform_0(%arg0: i32) -> (i32, i32) {
    %c0_i32 = arith.constant 0 : i32
    %c0_i32_0 = arith.constant 0 : i32
    return %arg0, %c0_i32 : i32, i32
  }
  func.func @transform_1(%arg0: i32) -> (i32, i32) {
    %c0_i32 = arith.constant 0 : i32
    %c0_i32_0 = arith.constant 0 : i32
    %c0_i32_1 = arith.constant 0 : i32
    return %c0_i32, %c0_i32_0 : i32, i32
  }
  func.func @transform_2(%arg0: i32) -> (i32, i32) {
    %c0_i32 = arith.constant 0 : i32
    %c0_i32_0 = arith.constant 0 : i32
    %c0_i32_1 = arith.constant 0 : i32
    return %c0_i32, %c0_i32_0 : i32, i32
  }
  func.func @transform_3(%arg0: i32) -> (i32, i32) {
    %c0_i32 = arith.constant 0 : i32
    %c0_i32_0 = arith.constant 0 : i32
    %c0_i32_1 = arith.constant 0 : i32
    return %c0_i32, %c0_i32_0 : i32, i32
  }
  func.func @transform_4(%arg0: i32) -> (i32, i32) {
    %c0_i32 = arith.constant 0 : i32
    %c0_i32_0 = arith.constant 0 : i32
    %c0_i32_1 = arith.constant 0 : i32
    return %c0_i32, %c0_i32_0 : i32, i32
  }
  func.func @transform_5(%arg0: i32) -> (i32, i32) {
    %c0_i32 = arith.constant 0 : i32
    %c0_i32_0 = arith.constant 0 : i32
    return %arg0, %c0_i32 : i32, i32
  }
}

</mosaic_0001>

<bundles_post_ra>
// kernel: tpu_custom_call.1
= control target key start
LH: loop header
LB: loop body
LE: loop exit
PB: predicated region body
PF: predicated region fallthrough
CT: control target
= control target key end

     0   :  { %10 = vsyncpa [#allocation3], 0  ;;  %s1929_s0 = inlined_call_operand.hbm [shape: f32[512,128], index: 0, kind: input, shape index: {}]   ;;  %s1930_s1 = inlined_call_operand.hbm [shape: bf16[128,128], index: 1, kind: input, shape index: {}]   ;;  %s1931_s2 = inlined_call_operand.vmem [shape: f32[1,128], index: 2, kind: input, shape index: {}]   ;;  %s1932_s3 = inlined_call_operand.hbm [shape: bf16[128,128], index: 3, kind: input, shape index: {}]   ;;  %s1933_s4 = inlined_call_operand.vmem [shape: f32[1,128], index: 4, kind: input, shape index: {}]   ;;  %s1934_s5 = inlined_call_operand.hbm [shape: f32[512,128], index: 5, kind: output, shape index: {}]  }
   0x1   :  { %12 = vsyncpa [#allocation3 + $0x1], 0 }
   0x2   :  { %13 = vsyncpa [#allocation6], 0 }
   0x3   :  { %14 = vsyncpa [#allocation4], 0 }
   0x4   :  { %16 = vsyncpa [#allocation4 + $0x1], 0  ;;  %s1466_s18 = smov 0   ;;  %s1468_s19 = smov 0  }
   0x5   :  { %s1470_s20 = smov 0   ;;  %s1472_s21 = smov 0  }
   0x6 LB: > { %s1487_s22 = sadd.s32 4294967295, %s1424_s21   ;;  %s1005_s23 = sadd.s32 4294967294, %s1424_s21   ;;  %s1424_s21 = sphi %s1472_s21, %s1956_s21   ;;  %s1420_s20 = sphi %s1470_s20, %s1955_s20   ;;  %s1416_s19 = sphi %s1468_s19, %s1954_s19   ;;  %s1412_s18 = sphi %s1466_s18, %s1953_s18  }
   0x7   : > { %p42_p0 = scmp.ne.s32.totalorder %s1416_s19, %s1412_s18  ;;  %p1935_p1 = scmp.eq.s32.totalorder %s1487_s22, 0 }
   0x8   : > { %p156_p3 = scmp.eq.s32.totalorder %s1005_s23, 1  ;;  %p1006_p5 = scmp.ge.s32.totalorder %s1424_s21, 1 }
   0x9   : > { %p1496_p4 = por %p1935_p1, %p42_p0  ;;  %p163_p7 = scmp.lt.s32.totalorder %s1424_s21, 3 }
   0xa   : > { %p1501_p6 = por %p156_p3, %p42_p0  ;;  %s1426_s27 = smov [#allocation5]  }
   0xb   : > { %s1939_s24 = scalar_select %p1496_p4, 1, 0 }
   0xc   : > { %s1940_s25 = scalar_select %p1501_p6, 1, 0 }
   0xd   : > { %p1506_p8 = pnand %p1006_p5, %p163_p7  ;;  %s175_s28 = sshll.u32 %s1426_s27, 4  ;;  %s176_s28 = int_to_ptr.vmem [resolvable:$true] %s175_s28 }
   0xe   : > { %s1427_s30 = smov [#allocation7]   ;;  %s1287_s7 = scalar_lea.vmem %s176_s28, 1024 }
   0xf   : > { %s1941_s26 = scalar_select %p1506_p8, 1, 0 }
  0x10   : > { %p1199_p9 = pneg %p1506_p8  ;;  %s191_s6 = sshll.u32 %s1427_s30, 4  ;;  %s192_s6 = int_to_ptr.vmem [resolvable:$true] %s191_s6 }
  0x11   : > { %p1288_p13 = scmp.ne.s32.totalorder %s176_s28, %s1287_s7  ;;  %p1295_p5 = scmp.lt.s32.totalorder %s176_s28, %s176_s28 }
  0x12   : > { %p1515_p11 = pnand %p1199_p9, %p1935_p1  ;;  %p1296_p7 = scmp.lt.s32.totalorder %s1287_s7, %s1287_s7 }
  0x14   : > { %p1278_p12 = pneg %p1515_p11  ;;  %p1297_p10 = por %p1296_p7, %p1295_p5 }
  0x16   : > { %p1290_p0 = pnand %p1288_p13, %p1278_p12 }
  0x18   : > { %p1291_p3 = pneg %p1290_p0 }
  0x1a   : > { %p1298_p9 = pnand %p1297_p10, %p1291_p3 }
  0x1c   : > { %1301 = shalt.err (!%p1298_p9)
}
  0x1d   : > { %s1428_s8 = smov 64   ;;  %s1429_s9 = smov 4  }
  0x1e   : > { %1202 = dma.hbm_to_vmem [thread:$0]  (!%p1515_p11), %s1930_s1, 1024, %s176_s28, [#allocation6], %s1428_s8, %s1428_s8, %s1429_s9  }
  0x1f   : > { %s1313_s12 = scalar_lea.vmem %s192_s6, 1024  ;;  %p1321_p2 = scmp.lt.s32.totalorder %s192_s6, %s192_s6 }
  0x20   : > { %p1314_p1 = scmp.ne.s32.totalorder %s192_s6, %s1313_s12  ;;  %p1322_p6 = scmp.lt.s32.totalorder %s1313_s12, %s1313_s12 }
  0x22   : > { %p1316_p13 = pnand %p1314_p1, %p1278_p12  ;;  %p1323_p5 = por %p1322_p6, %p1321_p2 }
  0x24   : > { %p1317_p0 = pneg %p1316_p13 }
  0x26   : > { %p1324_p10 = pnand %p1323_p5, %p1317_p0 }
  0x28   : > { %1327 = shalt.err (!%p1324_p10)
}
  0x29   : > { %1205 = dma.hbm_to_vmem [thread:$0]  (!%p1515_p11), %s1932_s3, 1024, %s192_s6, [#allocation6], %s1428_s8, %s1428_s8, %s1429_s9  }
  0x2a   : > { %s1538_s15 = sadd.s32 1, %s1424_s21   ;;  %s29_s16 = sadd.s32 1, %s1420_s20 }
  0x2b   : > { %s26_s17 = ssub.s32 %s1424_s21, %s1538_s15  ;;  %p36_p1 = scmp.ne.s32.totalorder %s1420_s20, %s1416_s19 }
  0x2c   : > { %p27_p2 = scmp.eq.s32.totalorder %s26_s17, 0  ;;  %p37_p6 = scmp.eq.s32.totalorder %s1424_s21, 0 }
  0x2d   : > { %p1943_p12 = scmp.eq.s32.totalorder %s1487_s22, 1  ;;  %p1216_p7 = scmp.lt.s32.totalorder %s1424_s21, 2 }
  0x2e   : > { %s1554_s27 = scalar_select %p27_p2, %s1420_s20, %s29_s16  }
  0x2f   : > { %p1548_p3 = por %p1943_p12, %p36_p1  ;;  %p38_p9 = por %p37_p6, %p36_p1 }
  0x30   : > { %s208_s28 = sand.u32 1, %s1420_s20   ;;  %s1041_s30 = sshll.u32 %s1424_s21, 12 }
  0x31   : > { %s1944_s23 = scalar_select %p1548_p3, 1, 0 }
  0x32   : > { %s1010_s29 = sshll.u32 %s208_s28, 8  ;;  %s1561_s8 = scalar_lea.hbm %s1929_s0, %s1041_s30 }
  0x33   : > { %s212_s9 = scalar_lea.vmem [#allocation2], %s1010_s29  ;;  %p1565_p11 = pnand %p1216_p7, %p38_p9 }
  0x34   : > { %s219_s10 = sshll.u32 %s212_s9, 4  ;;  %s1569_s12 = scalar_lea.sflag [#allocation3], %s208_s28  ;;  %s1563_s10 = int_to_ptr.vmem [resolvable:$true] %s219_s10 }
  0x35   : > { %s1328_s13 = scalar_lea.hbm %s1561_s8, 4096  ;;  %p1330_p0 = pneg %p1565_p11 }
  0x36   : > { %p1329_p13 = scmp.ne.s32.totalorder %s1561_s8, %s1328_s13  ;;  %s1333_s17 = scalar_lea.hbm %s1929_s0, 8192 }
  0x37   : > { %p1334_p1 = scmp.lt.s32.totalorder %s1561_s8, %s1929_s0  ;;  %p1335_p2 = scmp.lt.s32.totalorder %s1333_s17, %s1328_s13 }
  0x38   : > { %p1331_p5 = pnand %p1330_p0, %p1329_p13 }
  0x39   : > { %p1336_p6 = por %p1335_p2, %p1334_p1 }
  0x3a   : > { %p1332_p10 = pneg %p1331_p5 }
  0x3c   : > { %p1337_p12 = pnand %p1336_p6, %p1332_p10 }
  0x3e   : > { %1340 = shalt.err (!%p1337_p12)
}
  0x3f   : > { %s1341_s28 = scalar_lea.vmem %s1563_s10, 4096  ;;  %s1430_s6 = smov [#allocation2]  }
  0x40   : > { %p1342_p7 = scmp.ne.s32.totalorder %s1563_s10, %s1341_s28  ;;  %s1346_s7 = sshll.u32 %s1430_s6, 4  ;;  %s1347_s7 = int_to_ptr.vmem [resolvable:$false] %s1346_s7 }
  0x41   : > { %s1348_s9 = scalar_lea.vmem %s1347_s7, 8192  ;;  %p1349_p5 = scmp.lt.s32.totalorder %s1563_s10, %s1347_s7 }
  0x42   : > { %p1344_p9 = pnand %p1342_p7, %p1330_p0  ;;  %p1350_p3 = scmp.lt.s32.totalorder %s1348_s9, %s1341_s28 }
  0x44   : > { %p1345_p13 = pneg %p1344_p9  ;;  %p1351_p4 = por %p1350_p3, %p1349_p5 }
  0x46   : > { %p1352_p8 = pnand %p1351_p4, %p1345_p13 }
  0x48   : > { %1355 = shalt.err (!%p1352_p8)
}
  0x49   : > { %s1431_s13 = smov 128   ;;  %s1432_s14 = smov 8  }
  0x4a   : > { %1209 = dma.hbm_to_vmem [thread:$0]  (!%p1565_p11), %s1561_s8, 4096, %s1563_s10, %s1569_s12, %s1431_s13, %s1431_s13, %s1432_s14  }
  0x4b   : > { %p1946_p0 = scmp.ne.s32.totalorder %s1941_s26, 0 }
  0x4c   : > { %s1593_s16 = sand.u32 (!%p1946_p0), 1, %s1416_s19   ;;  %p1947_p4 = scmp.ne.s32.totalorder (!%p1946_p0), %s1939_s24, 0 }
  0x4d   : > { %231 = sbr.rel (%p1946_p0) target bundleno = 598 (0x256), region = 40  ;;  %s1014_s17 = sshll.u32 (!%p1946_p0), %s1593_s16, 8 }
  0x4e   : > { %s234_s29 = scalar_lea.sflag (!%p1946_p0), [#allocation3], %s1593_s16  ;;  %s1599_s30 = scalar_lea.vmem (!%p1946_p0), [#allocation2], %s1014_s17 }
  0x52   : > { %1399 = dma.done.wait (%p1947_p4), %s234_s29, 4096  }
  0x53   : > { %1401 = vsyncadd (%p1947_p4), %s234_s29, 4294963200  ;;  %p1948_p8 = scmp.eq.s32.totalorder %s1487_s22, 0 }
  0x55   : > { %1403 = dma.done.wait (%p1948_p8), [#allocation6], 2048   ;;  %p1949_p3 = pmov %p1948_p8 }
  0x56   : > { %v1260_v0 = vld [vmem:[#allocation5 + $0x38] sm:$0xff]   ;;  %v1261_v1 = vld [vmem:[#allocation5 + $0x30] sm:$0xff]   ;;  %v1262_v2 = vld [vmem:[#allocation5 + $0x28] sm:$0xff]   ;;  %s1784_s11 = scalar_lea.vmem [#allocation8], %s1014_s17  ;;  %s1042_s12 = sshll.u32 %s1487_s22, 12 }
  0x57   : > { %1405 = vsyncadd (%p1949_p3), [#allocation6], 4294965248  ;;  %1091 = vmatprep.subr.bf16.mxu0 %v1260_v0  ;;  %v1263_v3 = vld [vmem:[#allocation5 + $0x20] sm:$0xff]   ;;  %v1613_v5 = vld [vmem:[%s1599_s30 + $0x8] sm:$0xff]  ;;  %s913_s28 = sshll.u32 %s1784_s11, 4  ;;  %s1881_s9 = scalar_lea.hbm %s1934_s5, %s1042_s12  ;;  %s1883_s28 = int_to_ptr.vmem [resolvable:$true] %s913_s28 }
  0x58   : > { %1092 = vmatpush3.bf16.msra.mxu0 %v1260_v0  ;;  %v1610_v4 = vld [vmem:[%s1599_s30] sm:$0xff]  ;;  %v1264_v7 = vld [vmem:[#allocation5 + $0x18] sm:$0xff]   ;;  %v1265_v8 = vld [vmem:[#allocation5 + $0x10] sm:$0xff]   ;;  %s900_s22 = scalar_lea.sflag [#allocation4], %s1593_s16  ;;  %s1356_s13 = scalar_lea.vmem %s1883_s28, 4096 }
  0x59   : > { %1093 = vmatprep.subr.bf16.mxu0 %v1261_v1  ;;  %v307_v6 = vpack.c.bf16 %v1613_v5, %v1610_v4  ;;  %v1266_v9 = vld [vmem:[#allocation5 + $0x8] sm:$0xff]   ;;  %v1268_v10 = vld [vmem:[#allocation7 + $0x38] sm:$0xff]   ;;  %v1269_v11 = vld [vmem:[#allocation7 + $0x30] sm:$0xff]   ;;  %p1357_p11 = scmp.ne.s32.totalorder %s1883_s28, %s1356_s13  ;;  %p1950_p10 = scmp.ne.s32.totalorder %s1944_s23, 0 }
  0x5a   : > { %1139 = vmatprep.subr.bf16.mxu1 %v1268_v10  ;;  %v1267_v12 = vld [vmem:[#allocation5] sm:$0xff]   ;;  %v1270_v13 = vld [vmem:[#allocation7 + $0x28] sm:$0xff]   ;;  %v1618_v14 = vld [vmem:[%s1599_s30 + $0x10] sm:$0xff]  ;;  %s1433_s14 = smov [#allocation8]  }
  0x5b   : > { %1107 = vmatprep.mubr.bf16.mxu0 %v307_v6  ;;  %1140 = vmatpush3.bf16.msra.mxu1 %v1268_v10  ;;  %v1621_v15 = vld [vmem:[%s1599_s30 + $0x18] sm:$0xff]  ;;  %v1271_v16 = vld [vmem:[#allocation7 + $0x20] sm:$0xff]   ;;  %v1627_v18 = vld [vmem:[%s1599_s30 + $0x28] sm:$0xff]  ;;  %p1358_p1 = pnand %p1357_p11, %p1950_p10  ;;  %s1360_s17 = sshll.u32 %s1433_s14, 4  ;;  %s1361_s17 = int_to_ptr.vmem [resolvable:$false] %s1360_s17 }
  0x5c   : > { %1094 = vmatpush3.bf16.msra.mxu0 %v1261_v1  ;;  %1141 = vmatprep.subr.bf16.mxu1 %v1269_v11  ;;  %v1624_v17 = vld [vmem:[%s1599_s30 + $0x20] sm:$0xff]  ;;  %v308_v19 = vpack.c.bf16 %v1621_v15, %v1618_v14  ;;  %v1272_v21 = vld [vmem:[#allocation7 + $0x18] sm:$0xff]   ;;  %v1634_v22 = vld [vmem:[%s1599_s30 + $0x30] sm:$0xff]  ;;  %s1362_s29 = scalar_lea.vmem %s1361_s17, 8192  ;;  %p1363_p6 = scmp.lt.s32.totalorder %s1883_s28, %s1361_s17 }
  0x5d   : > { %1095 = vmatprep.subr.bf16.mxu0 %v1262_v2  ;;  %v309_v20 = vpack.c.bf16 %v1627_v18, %v1624_v17  ;;  %v1637_v23 = vld [vmem:[%s1599_s30 + $0x38] sm:$0xff]  ;;  %v1640_v24 = vld [vmem:[%s1599_s30 + $0x40] sm:$0xff]  ;;  %v1643_v25 = vld [vmem:[%s1599_s30 + $0x48] sm:$0xff]  ;;  %p1359_p2 = pneg %p1358_p1  ;;  %p1364_p12 = scmp.lt.s32.totalorder %s1362_s29, %s1356_s13 }
  0x5e   : > { %v310_v26 = vpack.c.bf16 %v1637_v23, %v1634_v22  ;;  %v311_v27 = vpack.c.bf16 %v1643_v25, %v1640_v24  ;;  %v1650_v28 = vld [vmem:[%s1599_s30 + $0x50] sm:$0xff]  ;;  %v1653_v29 = vld [vmem:[%s1599_s30 + $0x58] sm:$0xff]  ;;  %v1656_v30 = vld [vmem:[%s1599_s30 + $0x60] sm:$0xff] }
  0x5f   : > { %1142 = vmatpush3.bf16.msra.mxu1 %v1269_v11  ;;  %v1659_v31 = vld [vmem:[%s1599_s30 + $0x68] sm:$0xff]  ;;  %v312_v32 = vpack.c.bf16 %v1653_v29, %v1650_v28  ;;  %v1666_v34 = vld [vmem:[%s1599_s30 + $0x70] sm:$0xff]  ;;  %v1669_v35 = vld [vmem:[%s1599_s30 + $0x78] sm:$0xff]  ;;  %p1365_p7 = por %p1364_p12, %p1363_p6 }
  0x60   : > { %1096 = vmatpush3.bf16.msra.mxu0 %v1262_v2  ;;  %1143 = vmatprep.subr.bf16.mxu1 %v1270_v13  ;;  %v313_v33 = vpack.c.bf16 %v1659_v31, %v1656_v30  ;;  %v1672_v36 = vld [vmem:[%s1599_s30 + $0x80] sm:$0xff]  ;;  %v1675_v37 = vld [vmem:[%s1599_s30 + $0x88] sm:$0xff]  ;;  %v314_v38 = vpack.c.bf16 %v1669_v35, %v1666_v34  ;;  %v1682_v40 = vld [vmem:[%s1599_s30 + $0x90] sm:$0xff] }
  0x61   : > { %1097 = vmatprep.subr.bf16.mxu0 %v1263_v3  ;;  %v315_v39 = vpack.c.bf16 %v1675_v37, %v1672_v36  ;;  %v1685_v41 = vld [vmem:[%s1599_s30 + $0x98] sm:$0xff]  ;;  %v1688_v42 = vld [vmem:[%s1599_s30 + $0xa0] sm:$0xff]  ;;  %v1691_v43 = vld [vmem:[%s1599_s30 + $0xa8] sm:$0xff]  ;;  %p1366_p9 = pnand %p1365_p7, %p1359_p2 }
  0x62   : > { %v316_v44 = vpack.c.bf16 %v1685_v41, %v1682_v40  ;;  %v317_v45 = vpack.c.bf16 %v1691_v43, %v1688_v42  ;;  %v1698_v46 = vld [vmem:[%s1599_s30 + $0xb0] sm:$0xff]  ;;  %v1701_v47 = vld [vmem:[%s1599_s30 + $0xb8] sm:$0xff]  ;;  %v1704_v48 = vld [vmem:[%s1599_s30 + $0xc0] sm:$0xff] }
  0x63   : > { %1144 = vmatpush3.bf16.msra.mxu1 %v1270_v13  ;;  %v1707_v49 = vld [vmem:[%s1599_s30 + $0xc8] sm:$0xff]  ;;  %v318_v50 = vpack.c.bf16 %v1701_v47, %v1698_v46  ;;  %v1714_v52 = vld [vmem:[%s1599_s30 + $0xd0] sm:$0xff]  ;;  %v1717_v53 = vld [vmem:[%s1599_s30 + $0xd8] sm:$0xff] }
  0x64   : > { %1098 = vmatpush3.bf16.msra.mxu0 %v1263_v3  ;;  %1145 = vmatprep.subr.bf16.mxu1 %v1271_v16  ;;  %v319_v51 = vpack.c.bf16 %v1707_v49, %v1704_v48  ;;  %v1720_v54 = vld [vmem:[%s1599_s30 + $0xe0] sm:$0xff]  ;;  %v1723_v55 = vld [vmem:[%s1599_s30 + $0xe8] sm:$0xff]  ;;  %v320_v56 = vpack.c.bf16 %v1717_v53, %v1714_v52  ;;  %v1730_v58 = vld [vmem:[%s1599_s30 + $0xf0] sm:$0xff] }
  0x65   : > { %1099 = vmatprep.subr.bf16.mxu0 %v1264_v7  ;;  %v321_v57 = vpack.c.bf16 %v1723_v55, %v1720_v54  ;;  %v1733_v59 = vld [vmem:[%s1599_s30 + $0xf8] sm:$0xff]  ;;  %v1273_v61 = vld [vmem:[#allocation7 + $0x10] sm:$0xff]   ;;  %v1274_v62 = vld [vmem:[#allocation7 + $0x8] sm:$0xff]  }
  0x66   : > { %v322_v60 = vpack.c.bf16 %v1733_v59, %v1730_v58  ;;  %v1275_v63 = vld [vmem:[#allocation7] sm:$0xff]  }
  0x67   : > { %1146 = vmatpush3.bf16.msra.mxu1 %v1271_v16  ;;  %v1740_v2 = vld [vmem:[%s1931_s2] ss:$0 sm:$0xff] }
  0x68   : > { %1100 = vmatpush3.bf16.msra.mxu0 %v1264_v7  ;;  %1147 = vmatprep.subr.bf16.mxu1 %v1272_v21 }
  0x69   : > { %1101 = vmatprep.subr.bf16.mxu0 %v1265_v8 }
  0x6b   : > { %1148 = vmatpush3.bf16.msra.mxu1 %v1272_v21 }
  0x6c   : > { %1102 = vmatpush3.bf16.msra.mxu0 %v1265_v8  ;;  %1149 = vmatprep.subr.bf16.mxu1 %v1273_v61 }
  0x6d   : > { %1103 = vmatprep.subr.bf16.mxu0 %v1266_v9 }
  0x6f   : > { %1150 = vmatpush3.bf16.msra.mxu1 %v1273_v61 }
  0x70   : > { %1104 = vmatpush3.bf16.msra.mxu0 %v1266_v9  ;;  %1151 = vmatprep.subr.bf16.mxu1 %v1274_v62 }
  0x71   : > { %1105 = vmatprep.subr.bf16.mxu0 %v1267_v12 }
  0x73   : > { %1152 = vmatpush3.bf16.msra.mxu1 %v1274_v62 }
  0x74   : > { %1106 = vmatpush3.bf16.msra.mxu0 %v1267_v12  ;;  %1153 = vmatprep.subr.bf16.mxu1 %v1275_v63 }
  0x77   : > { %1108 = vmatmul.mubr.bf16.vlgmr.msra.gmra.mxu0 %v308_v19  ;;  %1154 = vmatpush3.bf16.msra.mxu1 %v1275_v63 }
  0x78   : > { %1111 = vmatprep.mubr.bf16.mxu0 %v309_v20 }
  0x7f   : > { %1112 = vmatmul.mubr.bf16.gmra.mxu0 %v310_v26 }
  0x80   : > { %1115 = vmatprep.mubr.bf16.mxu0 %v311_v27 }
  0x87   : > { %1116 = vmatmul.mubr.bf16.gmra.mxu0 %v312_v32 }
  0x88   : > { %1119 = vmatprep.mubr.bf16.mxu0 %v313_v33 }
  0x8f   : > { %1120 = vmatmul.mubr.bf16.gmra.mxu0 %v314_v38 }
  0x90   : > { %1123 = vmatprep.mubr.bf16.mxu0 %v315_v39 }
  0x97   : > { %1124 = vmatmul.mubr.bf16.gmra.mxu0 %v316_v44 }
  0x98   : > { %1127 = vmatprep.mubr.bf16.mxu0 %v317_v45 }
  0x9f   : > { %1128 = vmatmul.mubr.bf16.gmra.mxu0 %v318_v50 }
  0xa0   : > { %1131 = vmatprep.mubr.bf16.mxu0 %v319_v51 }
  0xa7   : > { %1132 = vmatmul.mubr.bf16.gmra.mxu0 %v320_v56 }
  0xa8   : > { %1135 = vmatprep.mubr.bf16.mxu0 %v321_v57 }
  0xaf   : > { %1136 = vmatmul.mubr.bf16.gmra.mxu0 %v322_v60 }
 0x137   : > { %v1109_v0 = vpop.f32.mrf.mxu0 }
 0x138   : > { %v437_v8 = vadd.f32 %v1109_v0, %v1740_v2 }
 0x139   : > { %v428_v1 = vpop.f32.mrf.mxu0 }
 0x13a   : > { %v429_v6 = vadd.f32 %v1740_v2, %v428_v1  ;;  %v557_v19 = vmax.f32 %v437_v8, 0.0 }
 0x13b   : > { %v1110_v3 = vpop.f32.mrf.mxu0 }
 0x13c   : > { %v440_v7 = vadd.f32 %v1110_v3, %v1740_v2  ;;  %v555_v13 = vmax.f32 %v429_v6, 0.0 }
 0x13d   : > { %v431_v9 = vpop.f32.mrf.mxu0 }
 0x13e   : > { %v432_v10 = vadd.f32 %v1740_v2, %v431_v9  ;;  %v558_v11 = vmax.f32 %v440_v7, 0.0 }
 0x13f   : > { %v1113_v12 = vpop.f32.mrf.mxu0 }
 0x140   : > { %v556_v16 = vmax.f32 %v432_v10, 0.0  ;;  %v588_v26 = vpack.c.bf16 %v558_v11, %v557_v19  ;;  %v453_v38 = vadd.f32 %v1113_v12, %v1740_v2 }
 0x141   : > { %v444_v20 = vpop.f32.mrf.mxu0 }
 0x142   : > { %v587_v21 = vpack.c.bf16 %v556_v16, %v555_v13  ;;  %v445_v32 = vadd.f32 %v1740_v2, %v444_v20  ;;  %v561_v57 = vmax.f32 %v453_v38, 0.0 }
 0x143   : > { %v1114_v27 = vpop.f32.mrf.mxu0 }
 0x144   : > { %v456_v33 = vadd.f32 %v1114_v27, %v1740_v2  ;;  %1155 = vmatprep.mubr.bf16.mxu1 %v587_v21  ;;  %v559_v51 = vmax.f32 %v445_v32, 0.0 }
 0x145   : > { %v447_v39 = vpop.f32.mrf.mxu0  ;;  %1156 = vmatmul.mubr.bf16.vlgmr.msra.gmra.mxu1 %v588_v26 }
 0x146   : > { %v448_v44 = vadd.f32 %v1740_v2, %v447_v39  ;;  %v562_v45 = vmax.f32 %v456_v33, 0.0 }
 0x147   : > { %v1117_v50 = vpop.f32.mrf.mxu0 }
 0x148   : > { %v560_v56 = vmax.f32 %v448_v44, 0.0  ;;  %v590_v62 = vpack.c.bf16 %v562_v45, %v561_v57  ;;  %v469_v3 = vadd.f32 %v1117_v50, %v1740_v2 }
 0x149   : > { %v460_v60 = vpop.f32.mrf.mxu0 }
 0x14a   : > { %v589_v61 = vpack.c.bf16 %v560_v56, %v559_v51  ;;  %v461_v0 = vadd.f32 %v1740_v2, %v460_v60  ;;  %v565_v12 = vmax.f32 %v469_v3, 0.0 }
 0x14b   : > { %v1118_v63 = vpop.f32.mrf.mxu0 }
 0x14c   : > { %v472_v1 = vadd.f32 %v1118_v63, %v1740_v2  ;;  %1159 = vmatprep.mubr.bf16.mxu1 %v589_v61  ;;  %v563_v10 = vmax.f32 %v461_v0, 0.0 }
 0x14d   : > { %v463_v6 = vpop.f32.mrf.mxu0  ;;  %1160 = vmatmul.mubr.bf16.gmra.mxu1 %v590_v62 }
 0x14e   : > { %v464_v7 = vadd.f32 %v1740_v2, %v463_v6  ;;  %v566_v8 = vmax.f32 %v472_v1, 0.0 }
 0x14f   : > { %v1121_v9 = vpop.f32.mrf.mxu0 }
 0x150   : > { %v564_v11 = vmax.f32 %v464_v7, 0.0  ;;  %v592_v19 = vpack.c.bf16 %v566_v8, %v565_v12  ;;  %v485_v27 = vadd.f32 %v1121_v9, %v1740_v2 }
 0x151   : > { %v476_v13 = vpop.f32.mrf.mxu0 }
 0x152   : > { %v591_v16 = vpack.c.bf16 %v564_v11, %v563_v10  ;;  %v477_v21 = vadd.f32 %v1740_v2, %v476_v13  ;;  %v569_v50 = vmax.f32 %v485_v27, 0.0 }
 0x153   : > { %v1122_v20 = vpop.f32.mrf.mxu0 }
 0x154   : > { %v488_v26 = vadd.f32 %v1122_v20, %v1740_v2  ;;  %1163 = vmatprep.mubr.bf16.mxu1 %v591_v16  ;;  %v567_v44 = vmax.f32 %v477_v21, 0.0 }
 0x155   : > { %v479_v32 = vpop.f32.mrf.mxu0  ;;  %1164 = vmatmul.mubr.bf16.gmra.mxu1 %v592_v19 }
 0x156   : > { %v480_v33 = vadd.f32 %v1740_v2, %v479_v32  ;;  %v570_v38 = vmax.f32 %v488_v26, 0.0 }
 0x157   : > { %v1125_v39 = vpop.f32.mrf.mxu0 }
 0x158   : > { %v568_v45 = vmax.f32 %v480_v33, 0.0  ;;  %v594_v57 = vpack.c.bf16 %v570_v38, %v569_v50  ;;  %v501_v63 = vadd.f32 %v1125_v39, %v1740_v2 }
 0x159   : > { %v492_v51 = vpop.f32.mrf.mxu0 }
 0x15a   : > { %v593_v56 = vpack.c.bf16 %v568_v45, %v567_v44  ;;  %v493_v61 = vadd.f32 %v1740_v2, %v492_v51  ;;  %v573_v9 = vmax.f32 %v501_v63, 0.0 }
 0x15b   : > { %v1126_v60 = vpop.f32.mrf.mxu0 }
 0x15c   : > { %v504_v62 = vadd.f32 %v1126_v60, %v1740_v2  ;;  %1167 = vmatprep.mubr.bf16.mxu1 %v593_v56  ;;  %v571_v7 = vmax.f32 %v493_v61, 0.0 }
 0x15d   : > { %v495_v0 = vpop.f32.mrf.mxu0  ;;  %1168 = vmatmul.mubr.bf16.gmra.mxu1 %v594_v57 }
 0x15e   : > { %v496_v1 = vadd.f32 %v1740_v2, %v495_v0  ;;  %v574_v3 = vmax.f32 %v504_v62, 0.0 }
 0x15f   : > { %v1129_v6 = vpop.f32.mrf.mxu0 }
 0x160   : > { %v572_v8 = vmax.f32 %v496_v1, 0.0  ;;  %v596_v12 = vpack.c.bf16 %v574_v3, %v573_v9  ;;  %v517_v20 = vadd.f32 %v1129_v6, %v1740_v2 }
 0x161   : > { %v508_v10 = vpop.f32.mrf.mxu0 }
 0x162   : > { %v595_v11 = vpack.c.bf16 %v572_v8, %v571_v7  ;;  %v509_v16 = vadd.f32 %v1740_v2, %v508_v10  ;;  %v577_v39 = vmax.f32 %v517_v20, 0.0 }
 0x163   : > { %v1130_v13 = vpop.f32.mrf.mxu0 }
 0x164   : > { %v520_v19 = vadd.f32 %v1130_v13, %v1740_v2  ;;  %1171 = vmatprep.mubr.bf16.mxu1 %v595_v11  ;;  %v575_v33 = vmax.f32 %v509_v16, 0.0 }
 0x165   : > { %v511_v21 = vpop.f32.mrf.mxu0  ;;  %1172 = vmatmul.mubr.bf16.gmra.mxu1 %v596_v12 }
 0x166   : > { %v512_v26 = vadd.f32 %v1740_v2, %v511_v21  ;;  %v578_v27 = vmax.f32 %v520_v19, 0.0 }
 0x167   : > { %v1133_v32 = vpop.f32.mrf.mxu0 }
 0x168   : > { %v576_v38 = vmax.f32 %v512_v26, 0.0  ;;  %v598_v50 = vpack.c.bf16 %v578_v27, %v577_v39  ;;  %v533_v60 = vadd.f32 %v1133_v32, %v1740_v2 }
 0x169   : > { %v524_v44 = vpop.f32.mrf.mxu0 }
 0x16a   : > { %v597_v45 = vpack.c.bf16 %v576_v38, %v575_v33  ;;  %v525_v56 = vadd.f32 %v1740_v2, %v524_v44  ;;  %v581_v6 = vmax.f32 %v533_v60, 0.0  ;;  %v1777_v38 = vld [vmem:[%s1933_s4] ss:$0 sm:$0xff] }
 0x16b   : > { %v1134_v51 = vpop.f32.mrf.mxu0 }
 0x16c   : > { %v536_v57 = vadd.f32 %v1134_v51, %v1740_v2  ;;  %1175 = vmatprep.mubr.bf16.mxu1 %v597_v45  ;;  %v579_v1 = vmax.f32 %v525_v56, 0.0 }
 0x16d   : > { %v527_v61 = vpop.f32.mrf.mxu0  ;;  %1176 = vmatmul.mubr.bf16.gmra.mxu1 %v598_v50 }
 0x16e   : > { %v528_v62 = vadd.f32 %v1740_v2, %v527_v61  ;;  %v582_v63 = vmax.f32 %v536_v57, 0.0 }
 0x16f   : > { %v1137_v0 = vpop.f32.mrf.mxu0 }
 0x170   : > { %v580_v3 = vmax.f32 %v528_v62, 0.0  ;;  %v600_v9 = vpack.c.bf16 %v582_v63, %v581_v6  ;;  %v549_v13 = vadd.f32 %v1137_v0, %v1740_v2 }
 0x171   : > { %v540_v7 = vpop.f32.mrf.mxu0 }
 0x172   : > { %v599_v8 = vpack.c.bf16 %v580_v3, %v579_v1  ;;  %v541_v11 = vadd.f32 %v1740_v2, %v540_v7  ;;  %v585_v27 = vmax.f32 %v549_v13, 0.0 }
 0x173   : > { %v1138_v10 = vpop.f32.mrf.mxu0 }
 0x174   : > { %v552_v12 = vadd.f32 %v1138_v10, %v1740_v2  ;;  %1179 = vmatprep.mubr.bf16.mxu1 %v599_v8  ;;  %v583_v21 = vmax.f32 %v541_v11, 0.0 }
 0x175   : > { %v543_v16 = vpop.f32.mrf.mxu0  ;;  %1180 = vmatmul.mubr.bf16.gmra.mxu1 %v600_v9 }
 0x176   : > { %v544_v19 = vadd.f32 %v1740_v2, %v543_v16  ;;  %v586_v20 = vmax.f32 %v552_v12, 0.0 }
 0x178   : > { %v584_v26 = vmax.f32 %v544_v19, 0.0  ;;  %v602_v33 = vpack.c.bf16 %v586_v20, %v585_v27 }
 0x17a   : > { %v601_v32 = vpack.c.bf16 %v584_v26, %v583_v21 }
 0x17c   : > { %1183 = vmatprep.mubr.bf16.mxu1 %v601_v32 }
 0x17d   : > { %1184 = vmatmul.mubr.bf16.gmra.mxu1 %v602_v33 }
 0x205   : > { %v1157_v39 = vpop.f32.mrf.mxu1 }
 0x206   : > { %v717_v44 = vadd.f32 %v1157_v39, %v1777_v38 }
 0x207   : > { %v708_v45 = vpop.f32.mrf.mxu1 }
 0x208   : > { %v837_v2 = vadd.f32 %v717_v44, %v1618_v14  ;;  %v709_v50 = vadd.f32 %v1777_v38, %v708_v45 }
 0x209   : > { %v1158_v51 = vpop.f32.mrf.mxu1 }
 0x20a   : > { %869 = vst [vmem:[%s1784_s11 + $0x10] sm:$0xff] %v837_v2  ;;  %v835_v56 = vadd.f32 %v709_v50, %v1610_v4  ;;  %v720_v57 = vadd.f32 %v1158_v51, %v1777_v38 }
 0x20b   : > { %v711_v60 = vpop.f32.mrf.mxu1 }
 0x20c   : > { %867 = vst [vmem:[%s1784_s11] sm:$0xff] %v835_v56  ;;  %v838_v14 = vadd.f32 %v720_v57, %v1621_v15  ;;  %v712_v61 = vadd.f32 %v1777_v38, %v711_v60 }
 0x20d   : > { %v1161_v62 = vpop.f32.mrf.mxu1 }
 0x20e   : > { %870 = vst [vmem:[%s1784_s11 + $0x18] sm:$0xff] %v838_v14  ;;  %v836_v63 = vadd.f32 %v712_v61, %v1613_v5  ;;  %v733_v0 = vadd.f32 %v1161_v62, %v1777_v38 }
 0x20f   : > { %v724_v1 = vpop.f32.mrf.mxu1 }
 0x210   : > { %868 = vst [vmem:[%s1784_s11 + $0x8] sm:$0xff] %v836_v63  ;;  %v841_v4 = vadd.f32 %v733_v0, %v1634_v22  ;;  %v725_v3 = vadd.f32 %v1777_v38, %v724_v1 }
 0x211   : > { %v1162_v6 = vpop.f32.mrf.mxu1 }
 0x212   : > { %873 = vst [vmem:[%s1784_s11 + $0x30] sm:$0xff] %v841_v4  ;;  %v839_v15 = vadd.f32 %v725_v3, %v1624_v17  ;;  %v736_v7 = vadd.f32 %v1162_v6, %v1777_v38 }
 0x213   : > { %v727_v8 = vpop.f32.mrf.mxu1 }
 0x214   : > { %871 = vst [vmem:[%s1784_s11 + $0x20] sm:$0xff] %v839_v15  ;;  %v842_v5 = vadd.f32 %v736_v7, %v1637_v23  ;;  %v728_v9 = vadd.f32 %v1777_v38, %v727_v8 }
 0x215   : > { %v1165_v10 = vpop.f32.mrf.mxu1 }
 0x216   : > { %874 = vst [vmem:[%s1784_s11 + $0x38] sm:$0xff] %v842_v5  ;;  %v840_v22 = vadd.f32 %v728_v9, %v1627_v18  ;;  %v749_v11 = vadd.f32 %v1165_v10, %v1777_v38 }
 0x217   : > { %v740_v12 = vpop.f32.mrf.mxu1 }
 0x218   : > { %872 = vst [vmem:[%s1784_s11 + $0x28] sm:$0xff] %v840_v22  ;;  %v845_v17 = vadd.f32 %v749_v11, %v1650_v28  ;;  %v741_v13 = vadd.f32 %v1777_v38, %v740_v12 }
 0x219   : > { %v1166_v16 = vpop.f32.mrf.mxu1 }
 0x21a   : > { %877 = vst [vmem:[%s1784_s11 + $0x50] sm:$0xff] %v845_v17  ;;  %v843_v23 = vadd.f32 %v741_v13, %v1640_v24  ;;  %v752_v19 = vadd.f32 %v1166_v16, %v1777_v38 }
 0x21b   : > { %v743_v20 = vpop.f32.mrf.mxu1 }
 0x21c   : > { %875 = vst [vmem:[%s1784_s11 + $0x40] sm:$0xff] %v843_v23  ;;  %v846_v18 = vadd.f32 %v752_v19, %v1653_v29  ;;  %v744_v21 = vadd.f32 %v1777_v38, %v743_v20 }
 0x21d   : > { %v1169_v26 = vpop.f32.mrf.mxu1 }
 0x21e   : > { %878 = vst [vmem:[%s1784_s11 + $0x58] sm:$0xff] %v846_v18  ;;  %v844_v28 = vadd.f32 %v744_v21, %v1643_v25  ;;  %v765_v27 = vadd.f32 %v1169_v26, %v1777_v38 }
 0x21f   : > { %v756_v32 = vpop.f32.mrf.mxu1 }
 0x220   : > { %876 = vst [vmem:[%s1784_s11 + $0x48] sm:$0xff] %v844_v28  ;;  %v849_v24 = vadd.f32 %v765_v27, %v1666_v34  ;;  %v757_v33 = vadd.f32 %v1777_v38, %v756_v32 }
 0x221   : > { %v1170_v39 = vpop.f32.mrf.mxu1 }
 0x222   : > { %881 = vst [vmem:[%s1784_s11 + $0x70] sm:$0xff] %v849_v24  ;;  %v847_v29 = vadd.f32 %v757_v33, %v1656_v30  ;;  %v768_v44 = vadd.f32 %v1170_v39, %v1777_v38 }
 0x223   : > { %v759_v45 = vpop.f32.mrf.mxu1 }
 0x224   : > { %879 = vst [vmem:[%s1784_s11 + $0x60] sm:$0xff] %v847_v29  ;;  %v850_v25 = vadd.f32 %v768_v44, %v1669_v35  ;;  %v760_v2 = vadd.f32 %v1777_v38, %v759_v45 }
 0x225   : > { %v1173_v50 = vpop.f32.mrf.mxu1 }
 0x226   : > { %882 = vst [vmem:[%s1784_s11 + $0x78] sm:$0xff] %v850_v25  ;;  %v848_v34 = vadd.f32 %v760_v2, %v1659_v31  ;;  %v781_v51 = vadd.f32 %v1173_v50, %v1777_v38 }
 0x227   : > { %v772_v56 = vpop.f32.mrf.mxu1 }
 0x228   : > { %880 = vst [vmem:[%s1784_s11 + $0x68] sm:$0xff] %v848_v34  ;;  %v853_v30 = vadd.f32 %v781_v51, %v1682_v40  ;;  %v773_v57 = vadd.f32 %v1777_v38, %v772_v56 }
 0x229   : > { %v1174_v60 = vpop.f32.mrf.mxu1 }
 0x22a   : > { %885 = vst [vmem:[%s1784_s11 + $0x90] sm:$0xff] %v853_v30  ;;  %v851_v35 = vadd.f32 %v773_v57, %v1672_v36  ;;  %v784_v14 = vadd.f32 %v1174_v60, %v1777_v38 }
 0x22b   : > { %v775_v61 = vpop.f32.mrf.mxu1 }
 0x22c   : > { %883 = vst [vmem:[%s1784_s11 + $0x80] sm:$0xff] %v851_v35  ;;  %v854_v31 = vadd.f32 %v784_v14, %v1685_v41  ;;  %v776_v62 = vadd.f32 %v1777_v38, %v775_v61 }
 0x22d   : > { %v1177_v63 = vpop.f32.mrf.mxu1 }
 0x22e   : > { %886 = vst [vmem:[%s1784_s11 + $0x98] sm:$0xff] %v854_v31  ;;  %v852_v40 = vadd.f32 %v776_v62, %v1675_v37  ;;  %v797_v0 = vadd.f32 %v1177_v63, %v1777_v38 }
 0x22f   : > { %v788_v1 = vpop.f32.mrf.mxu1 }
 0x230   : > { %884 = vst [vmem:[%s1784_s11 + $0x88] sm:$0xff] %v852_v40  ;;  %v857_v36 = vadd.f32 %v797_v0, %v1698_v46  ;;  %v789_v4 = vadd.f32 %v1777_v38, %v788_v1 }
 0x231   : > { %v1178_v3 = vpop.f32.mrf.mxu1 }
 0x232   : > { %889 = vst [vmem:[%s1784_s11 + $0xb0] sm:$0xff] %v857_v36  ;;  %v855_v41 = vadd.f32 %v789_v4, %v1688_v42  ;;  %v800_v6 = vadd.f32 %v1178_v3, %v1777_v38 }
 0x233   : > { %v791_v15 = vpop.f32.mrf.mxu1 }
 0x234   : > { %887 = vst [vmem:[%s1784_s11 + $0xa0] sm:$0xff] %v855_v41  ;;  %v858_v37 = vadd.f32 %v800_v6, %v1701_v47  ;;  %v792_v7 = vadd.f32 %v1777_v38, %v791_v15 }
 0x235   : > { %v1181_v8 = vpop.f32.mrf.mxu1 }
 0x236   : > { %890 = vst [vmem:[%s1784_s11 + $0xb8] sm:$0xff] %v858_v37  ;;  %v856_v46 = vadd.f32 %v792_v7, %v1691_v43  ;;  %v813_v5 = vadd.f32 %v1181_v8, %v1777_v38 }
 0x237   : > { %v804_v9 = vpop.f32.mrf.mxu1 }
 0x238   : > { %888 = vst [vmem:[%s1784_s11 + $0xa8] sm:$0xff] %v856_v46  ;;  %v861_v42 = vadd.f32 %v813_v5, %v1714_v52  ;;  %v805_v10 = vadd.f32 %v1777_v38, %v804_v9 }
 0x239   : > { %v1182_v22 = vpop.f32.mrf.mxu1 }
 0x23a   : > { %893 = vst [vmem:[%s1784_s11 + $0xd0] sm:$0xff] %v861_v42  ;;  %v859_v47 = vadd.f32 %v805_v10, %v1704_v48  ;;  %v816_v11 = vadd.f32 %v1182_v22, %v1777_v38 }
 0x23b   : > { %v807_v12 = vpop.f32.mrf.mxu1 }
 0x23c   : > { %891 = vst [vmem:[%s1784_s11 + $0xc0] sm:$0xff] %v859_v47  ;;  %v862_v43 = vadd.f32 %v816_v11, %v1717_v53  ;;  %v808_v17 = vadd.f32 %v1777_v38, %v807_v12 }
 0x23d   : > { %v1185_v13 = vpop.f32.mrf.mxu1 }
 0x23e   : > { %894 = vst [vmem:[%s1784_s11 + $0xd8] sm:$0xff] %v862_v43  ;;  %v860_v52 = vadd.f32 %v808_v17, %v1707_v49  ;;  %v829_v16 = vadd.f32 %v1185_v13, %v1777_v38 }
 0x23f   : > { %v820_v23 = vpop.f32.mrf.mxu1 }
 0x240   : > { %892 = vst [vmem:[%s1784_s11 + $0xc8] sm:$0xff] %v860_v52  ;;  %v865_v48 = vadd.f32 %v829_v16, %v1730_v58  ;;  %v821_v19 = vadd.f32 %v1777_v38, %v820_v23 }
 0x241   : > { %v1186_v20 = vpop.f32.mrf.mxu1 }
 0x242   : > { %897 = vst [vmem:[%s1784_s11 + $0xf0] sm:$0xff] %v865_v48  ;;  %v863_v53 = vadd.f32 %v821_v19, %v1720_v54  ;;  %v832_v18 = vadd.f32 %v1186_v20, %v1777_v38 }
 0x243   : > { %v823_v49 = vpop.f32.mrf.mxu1 }
 0x244   : > { %895 = vst [vmem:[%s1784_s11 + $0xe0] sm:$0xff] %v863_v53  ;;  %v866_v21 = vadd.f32 %v832_v18, %v1733_v59  ;;  %v824_v26 = vadd.f32 %v1777_v38, %v823_v49 }
 0x246   : > { %898 = vst [vmem:[%s1784_s11 + $0xf8] sm:$0xff] %v866_v21  ;;  %v864_v54 = vadd.f32 %v824_v26, %v1723_v55 }
 0x248   : > { %896 = vst [vmem:[%s1784_s11 + $0xe8] sm:$0xff] %v864_v54 }
 0x249   : > { %1369 = shalt.err (!%p1366_p9)
}
 0x24a   : > { %s1370_s30 = scalar_lea.hbm %s1881_s9, 4096  ;;  %s1374_s8 = scalar_lea.hbm %s1934_s5, 8192 }
 0x24b   : > { %p1371_p13 = scmp.ne.s32.totalorder %s1881_s9, %s1370_s30  ;;  %p1375_p4 = scmp.lt.s32.totalorder %s1881_s9, %s1934_s5 }
 0x24c   : > { %p1376_p8 = scmp.lt.s32.totalorder %s1374_s8, %s1370_s30 }
 0x24d   : > { %p1372_p5 = pnand %p1371_p13, %p1950_p10 }
 0x24e   : > { %p1377_p3 = por %p1376_p8, %p1375_p4 }
 0x24f   : > { %p1373_p0 = pneg %p1372_p5 }
 0x251   : > { %p1378_p11 = pnand %p1377_p3, %p1373_p0 }
 0x253   : > { %1381 = shalt.err (!%p1378_p11)
}
 0x254   : > { %s1434_s12 = smov 128   ;;  %s1435_s6 = smov 8  }
 0x255   : > { %1197 = dma.vmem_to_hbm [thread:$0]  (%p1950_p10), %s1883_s28, 4096, %s1881_s9, %s900_s22, %s1434_s12, %s1434_s12, %s1435_s6  }
 0x256 PF: > { %s928_s7 = sand.u32 1, %s1412_s18   ;;  %p1951_p1 = scmp.ne.s32.totalorder %s1940_s25, 0 }
 0x257   : > { %p1952_p2 = scmp.ge.s32.totalorder %s1424_s21, 2  ;;  %s929_s13 = scalar_lea.sflag [#allocation4], %s928_s7 }
 0x259   : > { %p1211_p6 = pnand %p1952_p2, %p1951_p1 }
 0x25b   : > { %p1212_p12 = pneg %p1211_p6 }
 0x25d   : > { %1407 = dma.done.wait (%p1212_p12), %s929_s13, 4096  }
 0x25e   : > { %1409 = vsyncadd (%p1212_p12), %s929_s13, 4294963200  ;;  %p19_p7 = scmp.ge.s32.totalorder %s1538_s15, 4   ;;  %s1953_s18 = smov %s1416_s19 }
 0x25f   : > { %s1954_s19 = smov %s1420_s20  ;;  %s1955_s20 = smov %s1554_s27 }
 0x260   : > { %s1956_s21 = smov %s1538_s15  ;;  %21 = sbr.rel (!%p19_p7) target bundleno = 6 (0x6), region = 93 }
 0x265   :  { %934 = vsyncpa [#allocation3], 1 }
 0x266   :  { %936 = vsyncpa [#allocation3 + $0x1], 1 }
 0x267   :  { %937 = vsyncpa [#allocation6], 1 }
 0x268   :  { %938 = vsyncpa [#allocation4], 1 }
 0x269   :  { %940 = vsyncpa [#allocation4 + $0x1], 1 }

</bundles_post_ra>
